<compile_context>
chip_gen: v5e
topology: v5e:2x2
jax: 0.10.0
libtpu: 0.0.40
codegen_flags: <defaults>
</compile_context>

<pallas_src>
import functools
import math

import jax
import jax.numpy as jnp
from jax.experimental import pallas as pl
from jax.experimental.pallas import tpu as pltpu

_SUBLANE = 8
_LANE = 128
# Per-input-block budget counted as f32 bytes. With double-buffered in/out
# blocks plus f32 temporaries the working set stays ~<= 14 MiB — well under the
# scoped VMEM limit on every generation (v5e/v6e 128 MiB, v7x 64 MiB physical).
_BLOCK_BYTES_BUDGET = 2 * 1024 * 1024
# Raise scoped VMEM above the 16 MiB v5e default; still well below v7x's
# 64 MiB physical VMEM so it is safe on all chips.
_VMEM_LIMIT = 32 * 1024 * 1024


def _finish(e, s, out_dtype):
    """e / s with the heavy reciprocal on the EUP + one Newton refinement."""
    r = pl.reciprocal(s, approx=True)          # EUP vrcp (free slot)
    r = r * (2.0 - s * r)                      # cheap per-row Newton step -> ~f32 exact
    return (e * r).astype(out_dtype)


def _lane_softmax_kernel(x_ref, o_ref):
    # Softmax along the last (lane) axis of the tile.
    x = x_ref[...].astype(jnp.float32)
    m = jnp.max(x, axis=-1, keepdims=True)
    e = jnp.exp(x - m)
    s = jnp.sum(e, axis=-1, keepdims=True)
    o_ref[...] = _finish(e, s, o_ref.dtype)


def _sublane_softmax_kernel(x_ref, o_ref):
    # Softmax along the second-to-last (sublane) axis; lanes stay dense.
    x = x_ref[...].astype(jnp.float32)
    m = jnp.max(x, axis=-2, keepdims=True)
    e = jnp.exp(x - m)
    s = jnp.sum(e, axis=-2, keepdims=True)
    o_ref[...] = _finish(e, s, o_ref.dtype)


def _pick_row_block(R, D):
    """Row-block size for the (rows, D) lane-reduce layout."""
    budget_elems = _BLOCK_BYTES_BUDGET // 4  # sized against the f32 working copy
    br = max(_SUBLANE, (budget_elems // max(D, 1)) // _SUBLANE * _SUBLANE)
    if R > 4 * _SUBLANE:
        # Keep >= ~4 grid steps so v7x's two TensorCores both stay busy.
        cap = max(_SUBLANE, (pl.cdiv(R, 4) // _SUBLANE) * _SUBLANE)
        br = min(br, cap)
    if br >= R:
        return R  # single full block; full-dim escape hatch covers non-8-multiple R
    return br


def _pick_blocks_3d(P, C, S):
    """(prefix, lane) block sizes for the (P, C, S) sublane-reduce layout."""
    budget_elems = _BLOCK_BYTES_BUDGET // 4
    per_p = C * S
    if per_p <= budget_elems:
        bs = S                                   # lane-dense: full suffix on lanes
        bp = max(1, budget_elems // per_p)
        bp = min(bp, max(1, pl.cdiv(P, 4)))      # keep grid steps for megacore
        bp = min(bp, P)
    else:
        bp = 1
        bs = max(_LANE, (budget_elems // max(C, 1)) // _LANE * _LANE)
        if bs >= S:
            bs = S
    return bp, bs


def _softmax_lane(x2d):
    R, D = x2d.shape
    br = _pick_row_block(R, D)
    grid = (pl.cdiv(R, br),)
    return pl.pallas_call(
        _lane_softmax_kernel,
        out_shape=jax.ShapeDtypeStruct((R, D), x2d.dtype),
        grid=grid,
        in_specs=[pl.BlockSpec((br, D), lambda i: (i, 0))],
        out_specs=pl.BlockSpec((br, D), lambda i: (i, 0)),
        compiler_params=pltpu.CompilerParams(
            dimension_semantics=("parallel",),
            vmem_limit_bytes=_VMEM_LIMIT,
        ),
    )(x2d)


def _softmax_sublane(x3d):
    P, C, S = x3d.shape
    bp, bs = _pick_blocks_3d(P, C, S)
    grid = (pl.cdiv(P, bp), pl.cdiv(S, bs))
    return pl.pallas_call(
        _sublane_softmax_kernel,
        out_shape=jax.ShapeDtypeStruct((P, C, S), x3d.dtype),
        grid=grid,
        in_specs=[pl.BlockSpec((bp, C, bs), lambda i, j: (i, 0, j))],
        out_specs=pl.BlockSpec((bp, C, bs), lambda i, j: (i, 0, j)),
        compiler_params=pltpu.CompilerParams(
            dimension_semantics=("parallel", "parallel"),
            vmem_limit_bytes=_VMEM_LIMIT,
        ),
    )(x3d)


@functools.partial(jax.jit, static_argnames=("dim",))
def layer_softmax(x, dim):
    """Equivalent of LayerSoftmax(dim)(x) for an arbitrary-rank input."""
    ndim = x.ndim
    dim = dim % ndim
    shape = x.shape
    # TODO(synk): add an online-softmax (running max/sum accumulator over a
    # reduction grid axis) for vocab-sized softmax dims that don't fit one
    # VMEM block; current design requires the full reduction dim per block.
    if dim == ndim - 1:
        # Reduction axis is already the lane axis: flatten leading dims (free).
        D = shape[-1]
        R = math.prod(shape[:-1]) if ndim > 1 else 1
        y2d = _softmax_lane(x.reshape(R, D))
        return y2d.reshape(shape)
    # Sublane-reduction path: reshape (free) to (prefix, C, suffix) and reduce
    # over C while the flattened suffix stays lane-dense. No transposes.
    C = shape[dim]
    P = math.prod(shape[:dim]) if dim > 0 else 1
    S = math.prod(shape[dim + 1:])
    y3d = _softmax_sublane(x.reshape(P, C, S))
    return y3d.reshape(shape)


if __name__ == "__main__":
    key = jax.random.PRNGKey(0)

    # NCHW input, softmax over the channel dim (dim=1), mirroring nn.Softmax(dim=1).
    x = jax.random.normal(key, (2, 4, 16, 16), dtype=jnp.float32)
    dim = 1
    out = jax.block_until_ready(layer_softmax(x, dim))
    ref = jax.nn.softmax(x, axis=dim)
    assert out.shape == x.shape and out.dtype == x.dtype
    assert jnp.allclose(out, ref, atol=1e-5, rtol=1e-5)

    # Also exercise the lane-reduce path (softmax over the last axis).
    x2 = jax.random.normal(jax.random.PRNGKey(1), (8, 32, 128), dtype=jnp.float32)
    out2 = jax.block_until_ready(layer_softmax(x2, -1))
    ref2 = jax.nn.softmax(x2, axis=-1)
    assert out2.shape == x2.shape and out2.dtype == x2.dtype
    assert jnp.allclose(out2, ref2, atol=1e-5, rtol=1e-5)

    print("KERNEL_OK")
</pallas_src>

<mosaic_0001>
module attributes {stable_mosaic.version = 11 : i64} {
  func.func @_sublane_softmax_kernel(%arg0: i32, %arg1: i32, %arg2: memref<1x4x256xf32, #tpu.memory_space<vmem>>, %arg3: memref<1x4x256xf32, #tpu.memory_space<vmem>>) attributes {dimension_semantics = [#tpu.dimension_semantics<parallel>, #tpu.dimension_semantics<parallel>], iteration_bounds = array<i64: 2, 1>, scalar_prefetch = 0 : i64, scratch_operands = 0 : i64, tpu.core_type = #tpu.core_type<tc>, window_params = [{transform_indices = @transform_0, window_bounds = array<i64: 1, 4, 256>}, {transform_indices = @transform_1, window_bounds = array<i64: 1, 4, 256>}]} {
    %c0 = arith.constant 0 : index
    %c0_0 = arith.constant 0 : index
    %c0_1 = arith.constant 0 : index
    %0 = vector.load %arg2[%c0, %c0_0, %c0_1] : memref<1x4x256xf32, #tpu.memory_space<vmem>>, vector<1x4x256xf32>
    %cst = arith.constant dense<0xFF800000> : vector<1x256xf32>
    %1 = vector.multi_reduction <maximumf>, %0, %cst [1] : vector<1x4x256xf32> to vector<1x256xf32>
    %2 = vector.shape_cast %1 : vector<1x256xf32> to vector<1x1x256xf32>
    %3 = vector.broadcast %2 : vector<1x1x256xf32> to vector<1x4x256xf32>
    %4 = arith.subf %0, %3 : vector<1x4x256xf32>
    %5 = math.exp %4 : vector<1x4x256xf32>
    %cst_2 = arith.constant dense<0.000000e+00> : vector<1x256xf32>
    %6 = vector.multi_reduction <add>, %5, %cst_2 [1] : vector<1x4x256xf32> to vector<1x256xf32>
    %7 = vector.shape_cast %6 : vector<1x256xf32> to vector<1x1x256xf32>
    %8 = tpu.reciprocal %7 {approx = true} : vector<1x1x256xf32> -> vector<1x1x256xf32>
    %9 = arith.mulf %7, %8 : vector<1x1x256xf32>
    %cst_3 = arith.constant 2.000000e+00 : f32
    %10 = vector.broadcast %cst_3 : f32 to vector<1x1x256xf32>
    %11 = arith.subf %10, %9 : vector<1x1x256xf32>
    %12 = arith.mulf %8, %11 : vector<1x1x256xf32>
    %13 = vector.broadcast %12 : vector<1x1x256xf32> to vector<1x4x256xf32>
    %14 = arith.mulf %5, %13 : vector<1x4x256xf32>
    %c0_4 = arith.constant 0 : index
    %c0_5 = arith.constant 0 : index
    %c0_6 = arith.constant 0 : index
    %15 = vector.load %arg3[%c0_4, %c0_5, %c0_6] : memref<1x4x256xf32, #tpu.memory_space<vmem>>, vector<1x4x256xf32>
    tpu.vector_store %arg3[%c0_4, %c0_5, %c0_6], %14 {strides = array<i32>} : memref<1x4x256xf32, #tpu.memory_space<vmem>>, vector<1x4x256xf32>,
    return
  }
  func.func @transform_0(%arg0: i32, %arg1: i32) -> (i32, i32, i32) {
    %c0_i32 = arith.constant 0 : i32
    %c0_i32_0 = arith.constant 0 : i32
    return %arg0, %c0_i32, %arg1 : i32, i32, i32
  }
  func.func @transform_1(%arg0: i32, %arg1: i32) -> (i32, i32, i32) {
    %c0_i32 = arith.constant 0 : i32
    %c0_i32_0 = arith.constant 0 : i32
    return %arg0, %c0_i32, %arg1 : i32, i32, i32
  }
}

</mosaic_0001>

<bundles_post_ra>
// kernel: layer_softmax.1
= control target key start
LH: loop header
LB: loop body
LE: loop exit
PB: predicated region body
PF: predicated region fallthrough
CT: control target
= control target key end

     0   :  { %s385_s6 = smov 0   ;;  %s387_s7 = smov 0   ;;  %s431_s0 = inlined_call_operand.vmem [shape: f32[2,4,256], index: 0, kind: input, shape index: {}]   ;;  %s432_s1 = inlined_call_operand.vmem [shape: f32[2,4,256], index: 1, kind: output, shape index: {}]  }
   0x1   :  { %s389_s8 = smov 0  }
   0x2 LB: > { %s23_s9 = sadd.s32 1, %s369_s7  ;;  %p312_p0 = scmp.ge.s32.totalorder %s373_s8, 1  ;;  %s373_s8 = sphi %s389_s8, %s11_s8   ;;  %s369_s7 = sphi %s387_s7, %s434_s7   ;;  %s365_s6 = sphi %s385_s6, %s433_s6  }
   0x3   : > { %p25_p1 = scmp.ge.s32.totalorder %s23_s9, 2  ;;  %p108_p2 = scmp.lt.s32.totalorder %s373_s8, 3 }
   0x5   : > { %s436_s9 = smov (%p25_p1, %s23_s9), 0  ;;  %p109_p3 = pnand %p312_p0, %p108_p2 }
   0x6   : > { %p137_p4 = scmp.lt.s32.totalorder (!%p109_p3), %s365_s6, 1 }
   0x7   : > { %112 = sbr.rel (%p109_p3) target bundleno = 92 (0x5c), region = 24 }
   0xc   : > { %s438_s6 = smov (!%p137_p4, %s365_s6), 1  ;;  %vm163_vm0 = vcmask 1043456  }
   0xd   : > { %s319_s10 = sshll.u32 %s438_s6, 3 }
   0xe   : > { %s144_s13 = scalar_lea.vmem %s431_s0, %s319_s10  ;;  %s154_s16 = scalar_lea.vmem %s432_s1, %s319_s10 }
   0xf   : > { %v156_v0 = vld [vmem:[%s144_s13] sm:$0xff] }
  0x10   : > { %158 = vst [vmem:[#allocation1] ss:$2 sm:$0xff] %v156_v0 }
  0x17   : > { %v159_v1 = vld.sshfl [vmem:[#allocation1] sm:$0xff pattern:$0x75316420]  ;;  %v160_v2 = vld.sshfl [vmem:[#allocation1 + $0x8] sm:$0xff pattern:$0x75316420] }
  0x18   : > { %v164_v3 = vsel %vm163_vm0, %v159_v1, -inf  ;;  %v171_v4 = vsel %vm163_vm0, %v160_v2, -inf }
  0x19   : > { %v165_v5 = vrot.slane %v164_v3, 4  ;;  %v172_v6 = vrot.slane %v171_v4, 4 }
  0x1b   : > { %v166_v7 = vmax.f32 %v164_v3, %v165_v5  ;;  %v173_v8 = vmax.f32 %v171_v4, %v172_v6 }
  0x1d   : > { %v167_v9 = vrot.slane %v166_v7, 2  ;;  %v174_v10 = vrot.slane %v173_v8, 2 }
  0x1f   : > { %v168_v11 = vmax.f32 %v166_v7, %v167_v9  ;;  %v175_v12 = vmax.f32 %v173_v8, %v174_v10 }
  0x21   : > { %v169_v13 = vrot.slane %v168_v11, 1  ;;  %v176_v14 = vrot.slane %v175_v12, 1 }
  0x23   : > { %v177_v15 = vmax.f32 %v175_v12, %v176_v14  ;;  %v170_v16 = vmax.f32 %v168_v11, %v169_v13 }
  0x25   : > { %v180_v17 = vrot.slane %v177_v15, 4 }
  0x27   : > { %v181_v18 = vsel %vm163_vm0, %v170_v16, %v180_v17 }
  0x28   : > { %v183_v19 = vsub.f32 %v156_v0, %v181_v18 }
  0x2a   : > { %v184_v20 = vmul.f32 1.442695, %v183_v19 }
  0x2c   : > { %345 = vpow2.f32 %v184_v20 }
  0x32   : > { %v346_v21 = vpop.eup %345 }
  0x33   : > { %187 = vst [vmem:[#allocation1] ss:$2 sm:$0xff] %v346_v21 }
  0x3a   : > { %v188_v22 = vld.sshfl [vmem:[#allocation1] sm:$0xff pattern:$0x75316420]  ;;  %v189_v23 = vld.sshfl [vmem:[#allocation1 + $0x8] sm:$0xff pattern:$0x75316420] }
  0x3b   : > { %v192_v24 = vsel %vm163_vm0, %v188_v22, 0.0  ;;  %v199_v25 = vsel %vm163_vm0, %v189_v23, 0.0 }
  0x3c   : > { %v193_v26 = vrot.slane %v192_v24, 4  ;;  %v200_v27 = vrot.slane %v199_v25, 4 }
  0x3e   : > { %v194_v28 = vadd.f32 %v193_v26, %v192_v24  ;;  %v201_v29 = vadd.f32 %v200_v27, %v199_v25 }
  0x40   : > { %v195_v30 = vrot.slane %v194_v28, 2  ;;  %v202_v31 = vrot.slane %v201_v29, 2 }
  0x42   : > { %v196_v32 = vadd.f32 %v195_v30, %v194_v28  ;;  %v203_v33 = vadd.f32 %v202_v31, %v201_v29 }
  0x44   : > { %v197_v34 = vrot.slane %v196_v32, 1  ;;  %v204_v35 = vrot.slane %v203_v33, 1 }
  0x46   : > { %v198_v36 = vadd.f32 %v197_v34, %v196_v32  ;;  %v205_v37 = vadd.f32 %v204_v35, %v203_v33 }
  0x48   : > { %347 = vrcp.f32 %v198_v36 }
  0x49   : > { %349 = vrcp.f32 %v205_v37 }
  0x4e   : > { %v348_v38 = vpop.eup %347 }
  0x4f   : > { %v350_v39 = vpop.eup %349  ;;  %v208_v40 = vmul.f32 %v348_v38, %v198_v36 }
  0x50   : > { %v209_v41 = vmul.f32 %v350_v39, %v205_v37 }
  0x51   : > { %v210_v42 = vsub.f32 2.0, %v208_v40 }
  0x52   : > { %v211_v43 = vsub.f32 2.0, %v209_v41 }
  0x53   : > { %v212_v45 = vmul.f32 %v348_v38, %v210_v42 }
  0x54   : > { %v213_v44 = vmul.f32 %v350_v39, %v211_v43 }
  0x56   : > { %v216_v46 = vrot.slane %v213_v44, 4 }
  0x58   : > { %v217_v47 = vsel %vm163_vm0, %v212_v45, %v216_v46 }
  0x59   : > { %v219_v48 = vmul.f32 %v346_v21, %v217_v47 }
  0x5b   : > { %220 = vst [vmem:[%s154_s16] sm:$0xff] %v219_v48 }
  0x5c PF: > { %s11_s8 = sadd.s32 1, %s373_s8   ;;  %s433_s6 = smov %s369_s7 }
  0x5d   : > { %p8_p5 = scmp.ge.s32.totalorder %s11_s8, 4   ;;  %s434_s7 = smov %s436_s9 }
  0x5f   :  { %10 = sbr.rel (!%p8_p5) target bundleno = 2 (0x2), region = 54 }

</bundles_post_ra>
